<compile_context>
chip_gen: v7x
topology: tpu7x:2x2x1
jax: 0.10.0
libtpu: 0.0.40
codegen_flags: <defaults>
</compile_context>

<pallas_src>
import functools

import jax
import jax.numpy as jnp
from jax.experimental import pallas as pl
from jax.experimental.pallas import tpu as pltpu

_INV_SQRT2 = 0.7071067811865476  # 1/sqrt(2), Python float -> jaxpr literal


def _se_kernel(x_ref, w1t_ref, w2t_ref, o_ref, *, inv_hw):
    # x_ref:  (Bt, C, HW)  native dtype (f32 or bf16)
    # w1t_ref:(C, Hd)      f32   (transposed first Linear weight)
    # w2t_ref:(Hd, C)      f32   (transposed second Linear weight)
    # inv_hw: Python float (1/HW) -> stays a literal, no captured const.

    # --- Squeeze: f32-accumulated sum over the lane (HW) axis, fold 1/HW as a mul ---
    pooled = jnp.sum(x_ref[...].astype(jnp.float32), axis=-1) * inv_hw          # (Bt, C)

    # --- Excitation MLP: Linear -> exact (erf) GELU -> Linear -> Sigmoid, all f32 ---
    h = jnp.dot(pooled, w1t_ref[...], preferred_element_type=jnp.float32)       # (Bt, Hd)
    h = 0.5 * h * (1.0 + jax.lax.erf(h * _INV_SQRT2))
    s = jnp.dot(h, w2t_ref[...], preferred_element_type=jnp.float32)            # (Bt, C)
    s = jax.nn.sigmoid(s)

    # --- Scale: re-read x_ref (caps vreg live range), broadcast s over HW lanes ---
    o_ref[...] = x_ref[...] * s.astype(o_ref.dtype)[:, :, None]


def se_forward(x_nchw, w1, w2, *, batch_tile=None, tile_budget_bytes=2 * 1024 * 1024):
    """Pallas SE forward.

    x_nchw : (B, C, H, W), any float dtype — kept end-to-end (bf16 recommended).
    w1     : (hidden, C)  first Linear weight  (PyTorch layout, bias-free).
    w2     : (C, hidden)  second Linear weight (PyTorch layout, bias-free).
    """
    B, C, H, W = x_nchw.shape
    HW = H * W
    hidden = w1.shape[0]

    x_flat = x_nchw.reshape(B, C, HW)             # free reshape, no dtype cast
    w1t = jnp.transpose(w1).astype(jnp.float32)   # (C, hidden)
    w2t = jnp.transpose(w2).astype(jnp.float32)   # (hidden, C)

    # Batch tile: largest divisor of B whose x tile stays under budget, so the
    # ~4 live copies (in + out, double-buffered) fit the v5e 16 MiB scoped VMEM
    # default while still amortizing per-grid-step overhead over several rows.
    per_sample = C * HW * x_flat.dtype.itemsize
    if batch_tile is None:
        batch_tile = 1
        for cand in range(1, B + 1):
            if B % cand == 0 and cand * per_sample <= tile_budget_bytes:
                batch_tile = cand
    bt = batch_tile
    grid = (B // bt,)

    # Only raise the scoped-VMEM limit if the per-step tiles actually need it;
    # otherwise stay on the conservative per-chip default.
    est_vmem = 4 * bt * per_sample + 8 * (w1t.size + w2t.size) + (1 << 20)
    vmem_limit = None
    if est_vmem > 12 * 1024 * 1024:
        vmem_limit = int(min(est_vmem * 5 // 4, 100 * 1024 * 1024))

    kernel = functools.partial(_se_kernel, inv_hw=float(1.0 / HW))

    out_flat = pl.pallas_call(
        kernel,
        out_shape=jax.ShapeDtypeStruct((B, C, HW), x_flat.dtype),
        grid=grid,
        in_specs=[
            pl.BlockSpec((bt, C, HW), lambda b: (b, 0, 0)),   # pipelined per-batch tile
            pl.BlockSpec((C, hidden), lambda b: (0, 0)),      # VMEM-resident weights
            pl.BlockSpec((hidden, C), lambda b: (0, 0)),
        ],
        out_specs=pl.BlockSpec((bt, C, HW), lambda b: (b, 0, 0)),
        compiler_params=pltpu.CompilerParams(
            dimension_semantics=("parallel",),   # shard batch steps across v7x's 2 TCs
            vmem_limit_bytes=vmem_limit,
        ),
    )(x_flat, w1t, w2t)

    return out_flat.reshape(B, C, H, W)


def se_reference(x_nchw, w1, w2):
    """Plain-JAX reference matching the PyTorch module (f32 math, output in x dtype)."""
    xf = x_nchw.astype(jnp.float32)
    y = jnp.mean(xf, axis=(2, 3))                                     # (B, C)
    h = y @ w1.T.astype(jnp.float32)                                  # (B, hidden)
    h = 0.5 * h * (1.0 + jax.lax.erf(h / jnp.sqrt(2.0)))              # exact GELU
    s = jax.nn.sigmoid(h @ w2.T.astype(jnp.float32))                  # (B, C)
    return (xf * s[:, :, None, None]).astype(x_nchw.dtype)


if __name__ == "__main__":
    # SE(inp=16, oup=16, expansion=0.25) -> C = 16, hidden = 4; HW = 256 (lane-dense)
    B, C, H, W = 2, 16, 16, 16
    hidden = int(16 * 0.25)

    key = jax.random.PRNGKey(0)
    kx, k1, k2 = jax.random.split(key, 3)
    x = jax.random.normal(kx, (B, C, H, W), dtype=jnp.float32)
    # PyTorch Linear weight layout: (out_features, in_features)
    w1 = jax.random.normal(k1, (hidden, C), dtype=jnp.float32) * 0.1
    w2 = jax.random.normal(k2, (C, hidden), dtype=jnp.float32) * 0.1

    # f32 path: exact match against the reference.
    out = se_forward(x, w1, w2)
    jax.block_until_ready(out)
    ref = se_reference(x, w1, w2)
    assert out.shape == (B, C, H, W)
    assert out.dtype == jnp.float32
    assert jnp.allclose(out, ref, atol=1e-5, rtol=1e-5), "f32 mismatch vs reference"

    # bf16 path: native-dtype end-to-end (halved HBM traffic), f32 pool/MLP inside.
    x_bf16 = x.astype(jnp.bfloat16)
    out_bf16 = se_forward(x_bf16, w1, w2)
    jax.block_until_ready(out_bf16)
    ref_bf16 = se_reference(x_bf16, w1, w2)
    assert out_bf16.dtype == jnp.bfloat16
    assert jnp.allclose(out_bf16.astype(jnp.float32), ref_bf16.astype(jnp.float32),
                        atol=2e-2, rtol=2e-2), "bf16 mismatch vs reference"

    print("KERNEL_OK")
</pallas_src>

<mosaic_0001>
module attributes {stable_mosaic.version = 11 : i64} {
  func.func @_se_kernel(%arg0: i32, %arg1: memref<2x16x256xf32, #tpu.memory_space<vmem>>, %arg2: memref<16x4xf32, #tpu.memory_space<vmem>>, %arg3: memref<4x16xf32, #tpu.memory_space<vmem>>, %arg4: memref<2x16x256xf32, #tpu.memory_space<vmem>>) attributes {dimension_semantics = [#tpu.dimension_semantics<parallel>], iteration_bounds = array<i64: 1>, scalar_prefetch = 0 : i64, scratch_operands = 0 : i64, tpu.core_type = #tpu.core_type<tc>, window_params = [{transform_indices = @transform_0, window_bounds = array<i64: 2, 16, 256>}, {pipeline_mode = #tpu.pipeline_mode<synchronous>, transform_indices = @transform_1, window_bounds = array<i64: 16, 4>}, {pipeline_mode = #tpu.pipeline_mode<synchronous>, transform_indices = @transform_2, window_bounds = array<i64: 4, 16>}, {transform_indices = @transform_3, window_bounds = array<i64: 2, 16, 256>}]} {
    %c0 = arith.constant 0 : index
    %c0_0 = arith.constant 0 : index
    %c0_1 = arith.constant 0 : index
    %0 = vector.load %arg1[%c0, %c0_0, %c0_1] : memref<2x16x256xf32, #tpu.memory_space<vmem>>, vector<2x16x256xf32>
    %cst = arith.constant dense<0.000000e+00> : vector<2x16xf32>
    %1 = vector.multi_reduction <add>, %0, %cst [2] : vector<2x16x256xf32> to vector<2x16xf32>
    %cst_2 = arith.constant 3.906250e-03 : f32
    %2 = vector.broadcast %cst_2 : f32 to vector<2x16xf32>
    %3 = arith.mulf %1, %2 : vector<2x16xf32>
    %c0_3 = arith.constant 0 : index
    %c0_4 = arith.constant 0 : index
    %4 = vector.load %arg2[%c0_3, %c0_4] : memref<16x4xf32, #tpu.memory_space<vmem>>, vector<16x4xf32>
    %cst_5 = arith.constant dense<0.000000e+00> : vector<2x4xf32>
    %5 = tpu.matmul %3, %4, %cst_5 {dimension_numbers = #tpu.dot_dimension_numbers<[1], [0], [0], [1], [0, 0, 1, 1], [], []>} : vector<2x16xf32>, vector<16x4xf32>, vector<2x4xf32> -> vector<2x4xf32>
    %cst_6 = arith.constant 5.000000e-01 : f32
    %6 = vector.broadcast %cst_6 : f32 to vector<2x4xf32>
    %7 = arith.mulf %6, %5 : vector<2x4xf32>
    %cst_7 = arith.constant 0.707106769 : f32
    %8 = vector.broadcast %cst_7 : f32 to vector<2x4xf32>
    %9 = arith.mulf %5, %8 : vector<2x4xf32>
    %10 = math.erf %9 : vector<2x4xf32>
    %cst_8 = arith.constant 1.000000e+00 : f32
    %11 = vector.broadcast %cst_8 : f32 to vector<2x4xf32>
    %12 = arith.addf %11, %10 : vector<2x4xf32>
    %13 = arith.mulf %7, %12 : vector<2x4xf32>
    %c0_9 = arith.constant 0 : index
    %c0_10 = arith.constant 0 : index
    %14 = vector.load %arg3[%c0_9, %c0_10] : memref<4x16xf32, #tpu.memory_space<vmem>>, vector<4x16xf32>
    %cst_11 = arith.constant dense<0.000000e+00> : vector<2x16xf32>
    %15 = tpu.matmul %13, %14, %cst_11 {dimension_numbers = #tpu.dot_dimension_numbers<[1], [0], [0], [1], [0, 0, 1, 1], [], []>} : vector<2x4xf32>, vector<4x16xf32>, vector<2x16xf32> -> vector<2x16xf32>
    %16 = arith.negf %15 : vector<2x16xf32>
    %17 = math.exp %16 : vector<2x16xf32>
    %cst_12 = arith.constant 1.000000e+00 : f32
    %18 = vector.broadcast %cst_12 : f32 to vector<2x16xf32>
    %19 = arith.addf %18, %17 : vector<2x16xf32>
    %20 = arith.divf %18, %19 : vector<2x16xf32>
    %c0_13 = arith.constant 0 : index
    %c0_14 = arith.constant 0 : index
    %c0_15 = arith.constant 0 : index
    %21 = vector.load %arg1[%c0_13, %c0_14, %c0_15] : memref<2x16x256xf32, #tpu.memory_space<vmem>>, vector<2x16x256xf32>
    %22 = vector.shape_cast %20 : vector<2x16xf32> to vector<2x16x1xf32>
    %23 = vector.broadcast %22 : vector<2x16x1xf32> to vector<2x16x256xf32>
    %24 = arith.mulf %21, %23 : vector<2x16x256xf32>
    %c0_16 = arith.constant 0 : index
    %c0_17 = arith.constant 0 : index
    %c0_18 = arith.constant 0 : index
    %25 = vector.load %arg4[%c0_16, %c0_17, %c0_18] : memref<2x16x256xf32, #tpu.memory_space<vmem>>, vector<2x16x256xf32>
    tpu.vector_store %arg4[%c0_16, %c0_17, %c0_18], %24 {strides = array<i32>} : memref<2x16x256xf32, #tpu.memory_space<vmem>>, vector<2x16x256xf32>,
    return
  }
  func.func @transform_0(%arg0: i32) -> (i32, i32, i32) {
    %c0_i32 = arith.constant 0 : i32
    %c0_i32_0 = arith.constant 0 : i32
    %c0_i32_1 = arith.constant 0 : i32
    return %arg0, %c0_i32, %c0_i32_0 : i32, i32, i32
  }
  func.func @transform_1(%arg0: i32) -> (i32, i32) {
    %c0_i32 = arith.constant 0 : i32
    %c0_i32_0 = arith.constant 0 : i32
    %c0_i32_1 = arith.constant 0 : i32
    return %c0_i32, %c0_i32_0 : i32, i32
  }
  func.func @transform_2(%arg0: i32) -> (i32, i32) {
    %c0_i32 = arith.constant 0 : i32
    %c0_i32_0 = arith.constant 0 : i32
    %c0_i32_1 = arith.constant 0 : i32
    return %c0_i32, %c0_i32_0 : i32, i32
  }
  func.func @transform_3(%arg0: i32) -> (i32, i32, i32) {
    %c0_i32 = arith.constant 0 : i32
    %c0_i32_0 = arith.constant 0 : i32
    %c0_i32_1 = arith.constant 0 : i32
    return %arg0, %c0_i32, %c0_i32_0 : i32, i32, i32
  }
}

</mosaic_0001>

<bundles_post_ra>
// kernel: tpu_custom_call.1
= control target key start
LH: loop header
LB: loop body
LE: loop exit
PB: predicated region body
PF: predicated region fallthrough
CT: control target
= control target key end

     0   :  { %8 = vsyncpa [#allocation3], 0  ;;  %s484_s0 = inlined_call_operand.hbm [shape: f32[2,16,256], index: 0, kind: input, shape index: {}]   ;;  %s485_s1 = inlined_call_operand.vmem [shape: f32[16,4], index: 1, kind: input, shape index: {}]   ;;  %s486_s2 = inlined_call_operand.vmem [shape: f32[4,16], index: 2, kind: input, shape index: {}]   ;;  %s487_s3 = inlined_call_operand.hbm [shape: f32[2,16,256], index: 3, kind: output, shape index: {}]  }
   0x1   :  { %9 = vsyncpa [#allocation4], 0  ;;  %s386_s12 = smov [#allocation2]   ;;  %s338_s16 = scalar_lea.hbm %s484_s0, 1024 }
   0x2   :  { %s15_s13 = sshll.u32 %s386_s12, 4  ;;  %p339_p0 = scmp.ne.s32.totalorder %s484_s0, %s338_s16  ;;  %s16_s13 = int_to_ptr.vmem [resolvable:$true] %s15_s13 }
   0x3   :  { %p342_p1 = scmp.lt.u32.totalorder %s338_s16, %s484_s0 }
   0x5   :  { %p344_p2 = pnand %p342_p1, %p339_p0 }
   0x7   :  { %347 = shalt.err (!%p344_p2)
}
   0x8   :  { %s348_s21 = scalar_lea.vmem %s16_s13, 1024  ;;  %p353_p4 = scmp.lt.s32.totalorder %s16_s13, %s16_s13 }
   0x9   :  { %p349_p3 = scmp.ne.s32.totalorder %s16_s13, %s348_s21  ;;  %p354_p5 = scmp.lt.s32.totalorder %s348_s21, %s348_s21 }
   0xb   :  { %p355_p6 = por %p354_p5, %p353_p4 }
   0xd   :  { %p356_p7 = pnand %p355_p6, %p349_p3 }
   0xf   :  { %359 = shalt.err (!%p356_p7)
}
  0x10   :  { %s387_s22 = smov 256   ;;  %s388_s23 = smov 16  }
  0x11   :  { %21 = dma.hbm_to_vmem [thread:$0]  %s484_s0, 1024, %s16_s13, [#allocation3], %s387_s22, %s387_s22, %s388_s23  }
  0x12   :  { %382 = dma.done.wait [#allocation3], 1024  }
  0x13   :  { %383 = vsyncadd [#allocation3], 4294966272  ;;  %v428_v0 = vld [vmem:[#allocation2 + $0x20] sm:$0xff]  ;;  %v430_v1 = vld [vmem:[#allocation2 + $0x28] sm:$0xff]  ;;  %v389_v15 = vmov 0.0|0.0   ;;  %vm390_vm0 = vmmov 0   ;;  %v59_v17 = vlaneseq }
  0x14   :  { %v432_v2 = vld [vmem:[#allocation2] sm:$0xff]  ;;  %v43_v3 = vadd.f32 %v430_v1, %v428_v0  ;;  %v436_v4 = vld [vmem:[#allocation2 + $0x8] sm:$0xff]  ;;  %v438_v5 = vld [vmem:[#allocation2 + $0x30] sm:$0xff]  ;;  %322 = vmatprep.subr.bf16.mxu0 %v389_v15  ;;  %v391_v16 = vmov 0.0   ;;  %vm70_vm1 = vcmask 130112   ;;  %vm81_vm2 = vcmask 1041409  }
  0x15   :  { %v440_v6 = vld [vmem:[#allocation2 + $0x38] sm:$0xff]  ;;  %v37_v7 = vadd.f32 %v436_v4, %v432_v2  ;;  %v444_v8 = vld [vmem:[#allocation2 + $0x10] sm:$0xff]  ;;  %v53_v12 = vld [vmem:[%s485_s1] sm:$0xff]  ;;  %314 = vmatprep.mubr.msk.f32.mxu0 %vm390_vm0, %v391_v16  ;;  %317 = vmatprep.subr.mxu1 %v391_v16  ;;  %v60_v18 = vand.u32 127, %v59_v17  ;;  %v62_v19 = vshrl.u32 %v59_v17, 7  ;;  %vm83_vm3 = vcmask 130048  }
  0x16   :  { %v446_v9 = vld [vmem:[#allocation2 + $0x18] sm:$0xff]  ;;  %44 = vadd.xlane.f32.xlu1 %v43_v3  ;;  %v46_v10 = vadd.f32 %v440_v6, %v438_v5  ;;  %v54_v13 = vld [vmem:[%s485_s1 + $0x8] sm:$0xff]  ;;  %319 = vmatprep.mubr.msk.f32.mxu1 %vm390_vm0, %v391_v16  ;;  %v161_v38 = vld [vmem:[%s486_s2] sm:$0xf]  ;;  %vm166_vm4 = vcmask 1043456   ;;  %vm162_vm5 = vcmask 31744  }
  0x17   :  { %38 = vadd.xlane.f32.xlu0 %v37_v7  ;;  %v40_v11 = vadd.f32 %v446_v9, %v444_v8  ;;  %v323_v14 = vpack.c.bf16 %v54_v13, %v53_v12  ;;  %v65_v20 = vadd.s32 4294967288, %v60_v18  ;;  %v63_v23 = vsub.s32 %v60_v18, %v62_v19  ;;  %318 = vmatpush3.msk.msra.mxu1 %vm166_vm4, %v161_v38  ;;  %s392_s2 = smov [#allocation5]  }
  0x18   :  { %v248_v51 = vsub.s32 0, %v62_v19  ;;  %v259_v54 = vsub.s32 1, %v62_v19  ;;  %s289_s30 = sshll.u32 %s392_s2, 4  ;;  %s290_s30 = int_to_ptr.vmem [resolvable:$true] %s289_s30 }
  0x19   :  { %324 = vmatpush3.bf16.msra.mxu0 %v323_v14  ;;  %v68_v25 = vsub.s32 %v65_v20, %v62_v19  ;;  %s360_s4 = scalar_lea.vmem %s290_s30, 1024  ;;  %p365_p9 = scmp.lt.s32.totalorder %s290_s30, %s290_s30 }
  0x1a   :  { %47 = vadd.xlane.f32.xlu1 %v46_v10  ;;  %p361_p8 = scmp.ne.s32.totalorder %s290_s30, %s360_s4  ;;  %p366_p10 = scmp.lt.s32.totalorder %s360_s4, %s360_s4 }
  0x1b   :  { %41 = vadd.xlane.f32.xlu0 %v40_v11 }
  0x1c   :  { %p367_p11 = por %p366_p10, %p365_p9 }
  0x1e   :  { %p368_p12 = pnand %p367_p11, %p361_p8 }
  0xa3   :  { %v45_v21 = vpop.xlane.xlu1 %44 }
  0xa4   :  { %v39_v22 = vpop.xlane.xlu0 %38  ;;  %v51_v24 = vmul.f32 0.00390625, %v45_v21 }
  0xa5   :  { %v49_v26 = vmul.f32 0.00390625, %v39_v22 }
  0xa6   :  { %v75_v31 = vrot.slane %v51_v24, %v63_v23 }
  0xa7   :  { %v48_v27 = vpop.xlane.xlu1 %47  ;;  %v64_v33 = vrot.slane %v49_v26, %v63_v23 }
  0xa8   :  { %v52_v28 = vmul.f32 0.00390625, %v48_v27  ;;  %v42_v29 = vpop.xlane.xlu0 %41 }
  0xa9   :  { %v50_v30 = vmul.f32 0.00390625, %v42_v29 }
  0xaa   :  { %v79_v32 = vrot.slane %v52_v28, %v68_v25 }
  0xab   :  { %v69_v34 = vrot.slane %v50_v30, %v68_v25 }
  0xac   :  { %v80_v35 = vsel %vm70_vm1, %v79_v32, %v75_v31 }
  0xad   :  { %v71_v36 = vsel %vm70_vm1, %v69_v34, %v64_v33 }
  0xae   :  { %v82_v37 = vsel %vm81_vm2, %v80_v35, %v71_v36 }
  0xaf   :  { %315 = vmatmul.mubr.msk.f32.vlgmr.msra.gmra.mrb[0].mxu0 %vm83_vm3, %v82_v37 }
 0x182   :  { %v152_v39 = vpop.f32.mrb[0].mxu0 }
 0x183   :  { %v157_v40 = vmul.f32 0.70710677, %v152_v39  ;;  %v316_v41 = vpop.f32.mrb[1].mxu0  ;;  %v156_v43 = vmul.f32 0.5, %v152_v39 }
 0x185   :  { %332 = verf.f32 %v157_v40 }
 0x18f   :  { %v333_v42 = vpop.eup %332 }
 0x190   :  { %v159_v44 = vadd.f32 1.0, %v333_v42 }
 0x192   :  { %v160_v45 = vmul.f32 %v159_v44, %v156_v43 }
 0x194   :  { %320 = vmatmul.mubr.msk.f32.vlgmr.msra.gmra.mrb[0].mxu1 %vm162_vm5, %v160_v45 }
 0x267   :  { %v236_v46 = vpop.f32.mrb[0].mxu1 }
 0x268   :  { %v304_v47 = vmul.f32 -1.442695, %v236_v46  ;;  %v321_v48 = vpop.f32.mrb[1].mxu1 }
 0x26a   :  { %334 = vpow2.f32 %v304_v47 }
 0x274   :  { %v335_v49 = vpop.eup %334 }
 0x275   :  { %v243_v50 = vadd.f32 1.0, %v335_v49 }
 0x277   :  { %336 = vrcp.f32 %v243_v50 }
 0x281   :  { %v337_v52 = vpop.eup %336 }
 0x282   :  { %v249_v53 = vrot.slane %v337_v52, %v248_v51  ;;  %v260_v55 = vrot.slane %v337_v52, %v259_v54 }
 0x284   :  { %255 = vbcast.lane.b32.xlu1 %v249_v53, 264  ;;  %251 = vbcast.lane.b32.xlu0 %v249_v53, 256 }
 0x288   :  { %262 = vbcast.lane.b32.xlu1 %v260_v55, 256 }
 0x28c   :  { %266 = vbcast.lane.b32.xlu1 %v260_v55, 264 }
 0x2f6   :  { %v256_v56 = vpop.permute.xlu1 %255  ;;  %v252_v57 = vpop.permute.xlu0 %251 }
 0x2f7   :  { %v270_v58 = vmul.f32 %v256_v56, %v444_v8  ;;  %v271_v59 = vmul.f32 %v256_v56, %v446_v9  ;;  %v268_v60 = vmul.f32 %v252_v57, %v432_v2  ;;  %v269_v61 = vmul.f32 %v252_v57, %v436_v4 }
 0x2f9   :  { %278 = vst [vmem:[#allocation5 + $0x10] sm:$0xff] %v270_v58  ;;  %279 = vst [vmem:[#allocation5 + $0x18] sm:$0xff] %v271_v59 }
 0x2fa   :  { %276 = vst [vmem:[#allocation5] sm:$0xff] %v268_v60  ;;  %277 = vst [vmem:[#allocation5 + $0x8] sm:$0xff] %v269_v61  ;;  %v263_v62 = vpop.permute.xlu1 %262 }
 0x2fb   :  { %v272_v63 = vmul.f32 %v263_v62, %v428_v0  ;;  %v273_v3 = vmul.f32 %v263_v62, %v430_v1 }
 0x2fd   :  { %280 = vst [vmem:[#allocation5 + $0x20] sm:$0xff] %v272_v63  ;;  %281 = vst [vmem:[#allocation5 + $0x28] sm:$0xff] %v273_v3 }
 0x2fe   :  { %v267_v7 = vpop.permute.xlu1 %266 }
 0x2ff   :  { %v274_v8 = vmul.f32 %v267_v7, %v438_v5  ;;  %v275_v2 = vmul.f32 %v267_v7, %v440_v6 }
 0x301   :  { %282 = vst [vmem:[#allocation5 + $0x30] sm:$0xff] %v274_v8  ;;  %283 = vst [vmem:[#allocation5 + $0x38] sm:$0xff] %v275_v2 }
 0x302   :  { %371 = shalt.err (!%p368_p12)
}
 0x303   :  { %s372_s7 = scalar_lea.hbm %s487_s3, 1024 }
 0x304   :  { %p373_p13 = scmp.ne.s32.totalorder %s487_s3, %s372_s7  ;;  %p376_p0 = scmp.lt.u32.totalorder %s372_s7, %s487_s3 }
 0x306   :  { %p378_p1 = pnand %p376_p0, %p373_p13 }
 0x308   :  { %381 = shalt.err (!%p378_p1)
}
 0x309   :  { %295 = dma.vmem_to_hbm [thread:$0]  %s290_s30, 1024, %s487_s3, [#allocation4], %s387_s22, %s387_s22, %s388_s23  }
 0x30a   :  { %384 = dma.done.wait [#allocation4], 1024  }
 0x30b   :  { %385 = vsyncadd [#allocation4], 4294966272 }
 0x30c   :  { %299 = vsyncpa [#allocation3], 1 }
 0x30d   :  { %300 = vsyncpa [#allocation4], 1 }

</bundles_post_ra>
